<compile_context>
chip_gen: v5e
topology: v5e:2x2
jax: 0.10.0
libtpu: 0.0.40
codegen_flags: <defaults>
</compile_context>

<pallas_src>
import functools

import jax
import jax.numpy as jnp
from jax.experimental import pallas as pl
from jax.experimental.pallas import tpu as pltpu


def _round_up(n: int, m: int) -> int:
    return ((n + m - 1) // m) * m


def _vmem_capacity_bytes() -> int:
    """Per-core VMEM capacity; conservative v7x default (64 MiB) if query fails."""
    try:
        return int(pltpu.get_tpu_info().vmem_capacity_bytes)
    except Exception:
        return 64 * 1024 * 1024


# ---------------------------------------------------------------------------
# Kernel bodies
# ---------------------------------------------------------------------------
def _conv1d_resident_kernel(x_ref, w_ref, b_ref, o_ref):
    """One (j, i) step of y = x @ W + b with the full-K weight panel resident.

    No K grid axis -> a single MXU pass produces the (tm, tn) tile in f32,
    bias is fused, and the tile is stored once in the output dtype.  The W and
    bias block indices are constant in i (the inner grid axis), so Pallas only
    re-DMAs them when j changes.
    """
    acc = jnp.dot(x_ref[...], w_ref[...], preferred_element_type=jnp.float32)
    o_ref[...] = (acc + b_ref[...].astype(jnp.float32)).astype(o_ref.dtype)


def _conv1d_kgrid_kernel(x_ref, w_ref, b_ref, o_ref, acc_ref):
    """Fallback (i, j, k) step for very large nx: K-streamed f32 accumulator."""
    k = pl.program_id(2)
    part = jnp.dot(x_ref[...], w_ref[...], preferred_element_type=jnp.float32)

    @pl.when(k == 0)
    def _():
        acc_ref[...] = part          # first K slab: direct write, no zero-fill pass

    @pl.when(k > 0)
    def _():
        acc_ref[...] += part

    @pl.when(k == pl.num_programs(2) - 1)
    def _():
        o_ref[...] = (acc_ref[...] + b_ref[...].astype(jnp.float32)).astype(o_ref.dtype)


# ---------------------------------------------------------------------------
# Wrapper
# ---------------------------------------------------------------------------
@functools.partial(jax.jit, static_argnames=("use_bf16_compute",))
def conv1d_forward(x, weight, bias, *, use_bf16_compute=True):
    """y = x @ weight + bias, x: [..., nx], weight: (nx, nf), bias: (nf,)."""
    nx, nf = weight.shape
    size_out = x.shape[:-1] + (nf,)
    out_dtype = x.dtype

    x2d = x.reshape(-1, nx)
    M = x2d.shape[0]

    # bf16 operands feed the MXU at full rate and halve DMA bytes; accumulation
    # stays f32 in-kernel and the output is returned in the caller's dtype.
    if use_bf16_compute and x2d.dtype == jnp.float32:
        x2d = x2d.astype(jnp.bfloat16)
        w = weight.astype(jnp.bfloat16)
    else:
        w = weight
    b2d = bias.reshape(1, nf)

    in_itemsize = jnp.dtype(x2d.dtype).itemsize
    out_itemsize = jnp.dtype(out_dtype).itemsize
    sublane = 16 if x2d.dtype == jnp.bfloat16 else 8

    # Generation-aware VMEM sizing (v7x: 64 MiB/core, v5e/v6e: 128 MiB).
    vmem_cap = _vmem_capacity_bytes()
    vmem_limit = (vmem_cap * 7) // 8          # headroom for Mosaic internal scratch
    tile_budget = (vmem_limit * 3) // 4       # budget for our double-buffered tiles

    def clamp_tiles(tm, tn):
        # Block dims must be (8,128)-aligned or equal the full array extent;
        # ragged M / nf edges are then handled by Pallas's masked edge blocks.
        tm = min(tm, _round_up(M, sublane))
        tn = nf if nf < 128 else min(tn, _round_up(nf, 128))
        return tm, tn

    def resident_footprint(tm, tn):
        # double-buffered resident W panel + x row panel + out tile (+ tiny bias)
        return (2 * (nx * tn + tm * nx) * in_itemsize
                + 2 * tm * tn * out_itemsize
                + 2 * tn * 4)

    chosen = None
    for tm_pref, tn_pref in ((512, 1024), (512, 512), (256, 512),
                             (256, 256), (128, 256), (128, 128)):
        tm, tn = clamp_tiles(tm_pref, tn_pref)
        if resident_footprint(tm, tn) <= tile_budget:
            chosen = (tm, tn)
            break

    cost = pl.CostEstimate(
        flops=2 * M * nx * nf,
        transcendentals=0,
        bytes_accessed=(x2d.size * in_itemsize + w.size * in_itemsize
                        + b2d.size * b2d.dtype.itemsize + M * nf * out_itemsize),
    )

    if chosen is not None:
        # ---- Primary path: full-K resident weight panel ----------------------
        tm, tn = chosen
        # j (output columns) outer, i (rows) inner -> each (nx, tn) weight panel
        # and bias slab is fetched once per j and stays resident while i streams.
        grid = (pl.cdiv(nf, tn), pl.cdiv(M, tm))
        out = pl.pallas_call(
            _conv1d_resident_kernel,
            out_shape=jax.ShapeDtypeStruct((M, nf), out_dtype),
            grid_spec=pltpu.PrefetchScalarGridSpec(
                num_scalar_prefetch=0,
                grid=grid,
                in_specs=[
                    pl.BlockSpec((tm, nx), lambda j, i: (i, 0)),   # x row panel
                    pl.BlockSpec((nx, tn), lambda j, i: (0, j)),   # resident W panel
                    pl.BlockSpec((1, tn), lambda j, i: (0, j)),    # bias slab
                ],
                out_specs=pl.BlockSpec((tm, tn), lambda j, i: (i, j)),
            ),
            compiler_params=pltpu.CompilerParams(
                dimension_semantics=("parallel", "parallel"),
                vmem_limit_bytes=vmem_limit,
            ),
            cost_estimate=cost,
        )(x2d, w, b2d)
        return out.reshape(size_out)

    # ---- Fallback path: nx too large for residency -> stream K ---------------
    tm, tn = clamp_tiles(256, 512)
    tk_pref = 1024 if in_itemsize == 2 else 512
    tk = min(tk_pref, _round_up(nx, 128))
    nx_pad = _round_up(nx, tk)
    if nx_pad != nx:
        # Only the reduction axis ever needs real zero padding (garbage K reads
        # would corrupt the sum); ragged M / nf edges stay masked, not padded.
        x2d = jnp.pad(x2d, ((0, 0), (0, nx_pad - nx)))
        w = jnp.pad(w, ((0, nx_pad - nx), (0, 0)))

    grid = (pl.cdiv(M, tm), pl.cdiv(nf, tn), nx_pad // tk)
    out = pl.pallas_call(
        _conv1d_kgrid_kernel,
        out_shape=jax.ShapeDtypeStruct((M, nf), out_dtype),
        grid_spec=pltpu.PrefetchScalarGridSpec(
            num_scalar_prefetch=0,
            grid=grid,
            in_specs=[
                pl.BlockSpec((tm, tk), lambda i, j, k: (i, k)),
                pl.BlockSpec((tk, tn), lambda i, j, k: (k, j)),
                pl.BlockSpec((1, tn), lambda i, j, k: (0, j)),
            ],
            out_specs=pl.BlockSpec((tm, tn), lambda i, j, k: (i, j)),
            scratch_shapes=[pltpu.VMEM((tm, tn), jnp.float32)],
        ),
        compiler_params=pltpu.CompilerParams(
            dimension_semantics=("parallel", "parallel", "arbitrary"),
            vmem_limit_bytes=vmem_limit,
        ),
        cost_estimate=cost,
    )(x2d, w, b2d)
    return out.reshape(size_out)


if __name__ == "__main__":
    # Deterministic parameter init mirroring the PyTorch module:
    #   weight ~ Normal(0, 0.02) of shape (nx, nf), bias = ones(nf)
    nx, nf = 32, 64        # input features, output features (small demo shapes)
    batch, seq = 2, 8      # leading dims (flattened for the matmul)

    key = jax.random.PRNGKey(0)
    k_w, k_x = jax.random.split(key)
    weight = 0.02 * jax.random.normal(k_w, (nx, nf), dtype=jnp.float32)
    bias = jnp.ones((nf,), dtype=jnp.float32)
    x = jax.random.normal(k_x, (batch, seq, nx), dtype=jnp.float32)

    y_ref = (x.reshape(-1, nx) @ weight + bias).reshape(batch, seq, nf)

    # Default path: bf16 MXU operands, f32 accumulation, f32 output.
    y = jax.block_until_ready(conv1d_forward(x, weight, bias))
    assert y.shape == (batch, seq, nf)
    assert jnp.allclose(y, y_ref, atol=2e-2, rtol=2e-2)

    # Full-f32 path (tight tolerance).
    y32 = jax.block_until_ready(conv1d_forward(x, weight, bias, use_bf16_compute=False))
    assert jnp.allclose(y32, y_ref, atol=1e-5, rtol=1e-5)

    print("KERNEL_OK")
</pallas_src>

<mosaic_0001>
module attributes {stable_mosaic.version = 11 : i64} {
  func.func @_conv1d_resident_kernel(%arg0: i32, %arg1: i32, %arg2: memref<16x32xbf16, #tpu.memory_space<vmem>>, %arg3: memref<32x64xbf16, #tpu.memory_space<vmem>>, %arg4: memref<1x64xf32, #tpu.memory_space<vmem>>, %arg5: memref<16x64xf32, #tpu.memory_space<vmem>>) attributes {dimension_semantics = [#tpu.dimension_semantics<parallel>, #tpu.dimension_semantics<parallel>], iteration_bounds = array<i64: 1, 1>, scalar_prefetch = 0 : i64, scratch_operands = 0 : i64, tpu.core_type = #tpu.core_type<tc>, window_params = [{transform_indices = @transform_0, window_bounds = array<i64: 16, 32>}, {transform_indices = @transform_1, window_bounds = array<i64: 32, 64>}, {transform_indices = @transform_2, window_bounds = array<i64: 1, 64>}, {transform_indices = @transform_3, window_bounds = array<i64: 16, 64>}]} {
    %c0 = arith.constant 0 : index
    %c0_0 = arith.constant 0 : index
    %0 = vector.load %arg2[%c0, %c0_0] : memref<16x32xbf16, #tpu.memory_space<vmem>>, vector<16x32xbf16>
    %c0_1 = arith.constant 0 : index
    %c0_2 = arith.constant 0 : index
    %1 = vector.load %arg3[%c0_1, %c0_2] : memref<32x64xbf16, #tpu.memory_space<vmem>>, vector<32x64xbf16>
    %cst = arith.constant dense<0.000000e+00> : vector<16x64xf32>
    %2 = tpu.matmul %0, %1, %cst {dimension_numbers = #tpu.dot_dimension_numbers<[1], [0], [0], [1], [0, 0, 1, 1], [], []>} : vector<16x32xbf16>, vector<32x64xbf16>, vector<16x64xf32> -> vector<16x64xf32>
    %c0_3 = arith.constant 0 : index
    %c0_4 = arith.constant 0 : index
    %3 = vector.load %arg4[%c0_3, %c0_4] : memref<1x64xf32, #tpu.memory_space<vmem>>, vector<1x64xf32>
    %4 = vector.broadcast %3 : vector<1x64xf32> to vector<16x64xf32>
    %5 = arith.addf %2, %4 : vector<16x64xf32>
    %c0_5 = arith.constant 0 : index
    %c0_6 = arith.constant 0 : index
    %6 = vector.load %arg5[%c0_5, %c0_6] : memref<16x64xf32, #tpu.memory_space<vmem>>, vector<16x64xf32>
    tpu.vector_store %arg5[%c0_5, %c0_6], %5 {strides = array<i32>} : memref<16x64xf32, #tpu.memory_space<vmem>>, vector<16x64xf32>,
    return
  }
  func.func @transform_0(%arg0: i32, %arg1: i32) -> (i32, i32) {
    %c0_i32 = arith.constant 0 : i32
    %c0_i32_0 = arith.constant 0 : i32
    return %arg1, %c0_i32 : i32, i32
  }
  func.func @transform_1(%arg0: i32, %arg1: i32) -> (i32, i32) {
    %c0_i32 = arith.constant 0 : i32
    %c0_i32_0 = arith.constant 0 : i32
    return %c0_i32, %arg0 : i32, i32
  }
  func.func @transform_2(%arg0: i32, %arg1: i32) -> (i32, i32) {
    %c0_i32 = arith.constant 0 : i32
    %c0_i32_0 = arith.constant 0 : i32
    return %c0_i32, %arg0 : i32, i32
  }
  func.func @transform_3(%arg0: i32, %arg1: i32) -> (i32, i32) {
    %c0_i32 = arith.constant 0 : i32
    return %arg1, %arg0 : i32, i32
  }
}

</mosaic_0001>

<bundles_post_ra>
// kernel: conv1d_forward.1
= control target key start
LH: loop header
LB: loop body
LE: loop exit
PB: predicated region body
PF: predicated region fallthrough
CT: control target
= control target key end

     0   :  { %s166_s0 = inlined_call_operand.vmem [shape: bf16[16,32], index: 0, kind: input, shape index: {}]   ;;  %s167_s1 = inlined_call_operand.vmem [shape: bf16[32,64], index: 1, kind: input, shape index: {}]   ;;  %s168_s2 = inlined_call_operand.vmem [shape: f32[1,64], index: 2, kind: input, shape index: {}]   ;;  %s169_s3 = inlined_call_operand.hbm [shape: f32[16,64], index: 3, kind: output, shape index: {}]  }
   0x1   :  { %v97_v0 = vld [vmem:[%s167_s1 + $0x8] sm:$0xff] }
   0x2   :  { %8 = vsyncpa [#allocation3], 0  ;;  %53 = vmatpush.bf16.msra.mxu0 %v97_v0  ;;  %v96_v1 = vld [vmem:[%s167_s1] sm:$0xff]  ;;  %vm43_vm0 = vcmask 261120   ;;  %vm61_vm1 = vcmask 523264   ;;  %s128_s20 = smov [#allocation2]  }
   0x3   :  { %v95_v2 = vld [vmem:[%s166_s0] sm:$0xff]  ;;  %s68_s21 = sshll.u32 %s128_s20, 4  ;;  %s70_s1 = sshll.u32 %s169_s3, 4  ;;  %s69_s21 = int_to_ptr.vmem [resolvable:$true] %s68_s21  ;;  %s71_s1 = int_to_ptr.hbm [resolvable:$true] %s70_s1 }
   0x4   :  { %v101_v3 = vld [vmem:[%s168_s2] ss:$0 sm:$0xff]  ;;  %s129_s0 = smov 128   ;;  %s130_s24 = smov 8  }
   0x6   :  { %54 = vmatpush.bf16.msra.mxu0 %v96_v1 }
   0x9   :  { %94 = vmatmul.msk.bf16.vlgmr.msra.gmra.mxu0 %vm43_vm0, %v95_v2 }
  0x86   :  { %v56_v4 = vpop.f32.mrf.mxu0 }
  0x87   :  { %v57_v5 = vadd.f32 %v101_v3, %v56_v4 }
  0x89   :  { %62 = vst.msk [vmem:[#allocation2] sm:$0xff] %vm61_vm1, %v57_v5 }
  0x8e   :  { %v58_v6 = vpop.f32.mrf.mxu0 }
  0x8f   :  { %v59_v7 = vadd.f32 %v101_v3, %v58_v6 }
  0x91   :  { %63 = vst.msk [vmem:[#allocation2 + $0x8] sm:$0xff] %vm61_vm1, %v59_v7 }
  0x92   :  { %76 = dma.vmem_to_hbm [thread:$0]  %s69_s21, 256, %s71_s1, [#allocation3], %s129_s0, %s129_s0, %s130_s24  }
  0x93   :  { %126 = dma.done.wait [#allocation3], 256  }
  0x94   :  { %127 = vsyncadd [#allocation3], 4294967040 }
  0x95   :  { %81 = vsyncpa [#allocation3], 1 }

</bundles_post_ra>
